<compile_context>
chip_gen: v5e
topology: v5e:2x2
jax: 0.10.0
libtpu: 0.0.40
codegen_flags: <defaults>
</compile_context>

<pallas_src>
import functools

import jax
import jax.numpy as jnp
from jax import lax
from jax.experimental import pallas as pl
from jax.experimental.pallas import tpu as pltpu

OUT_LANES = 128                       # lanes 0..2 hold (total, recon, kl)
OUT_SUBLANES = 8                      # pad output rows to a full (8, 128) tile
_SMALL_PATH_MAX_BYTES = 6 << 20       # gridless path only if all inputs fit well under
                                      # v5e's 16 MiB scoped-VMEM default
_TILE_F32_BYTES_PER_ROWSET = 4 << 20  # per-step f32-equivalent budget across (G + L) cols
_TILED_VMEM_FLOOR = 16 << 20
_TILED_VMEM_CAP = 48 << 20            # < v7x 64 MiB physical


def _round_up(n, m):
    return ((n + m - 1) // m) * m


def _sublane_multiple(dtype):
    # f32 -> 8, bf16 -> 16, int8/fp8 -> 32 (sub-32-bit packs along sublanes).
    return max(8, 32 // jnp.dtype(dtype).itemsize)


def _sum_all(x):
    # Full reduction keeping a (1, 1) array (avoid rank-0 values in-kernel).
    return jnp.sum(jnp.sum(x, axis=-1, keepdims=True), axis=-2, keepdims=True)


def _lane_dense_2d(a):
    """Flatten to a lane-dense (rows, 128) view, zero-padded to a full (8,128) tile.

    Zero padding is exact for both terms: (0-0)^2 == 0 and 1 + 0 - 0 - exp(0) == 0.
    """
    flat = a.reshape(-1)
    n = flat.shape[0]
    n_pad = _round_up(max(n, 1), OUT_SUBLANES * 128)
    if n_pad != n:
        flat = jnp.pad(flat, (0, n_pad - n))
    return flat.reshape(n_pad // 128, 128)


def elbo_loss_kernel(recon_x_ref, x_ref, mean_ref, log_var_ref, out_ref, *, kl_weight):
    """Shared body: full reduction of the current blocks -> one lane-packed row.

    Gridless path: blocks are the whole (lane-dense) arrays -> the row IS the answer.
    Tiled path: blocks are one batch tile -> the row is this tile's partial sums
    (everything is linear, so the wrapper just sums rows across tiles).
    """
    f32 = jnp.float32

    # ---- reconstruction: sum of squared error over this block ----
    diff = recon_x_ref[...].astype(f32) - x_ref[...].astype(f32)
    recon = _sum_all(diff * diff)                                   # (1, 1)

    # ---- KL( N(mean, exp(log_var)) || N(0, 1) ) over this block ----
    mean = mean_ref[...].astype(f32)
    log_var = log_var_ref[...].astype(f32)
    kl = -0.5 * _sum_all(1.0 + log_var - mean * mean - jnp.exp(log_var))   # (1, 1)

    # ---- total (kl_weight baked in as a compile-time constant) ----
    total = recon + kl_weight * kl                                  # (1, 1)

    # Pack the three scalars into one lane-dense row; broadcast over the 8 sublanes so
    # the store is a full unmasked (8, 128) tile (wrapper reads sublane 0 only).
    lane = lax.broadcasted_iota(jnp.int32, (1, 1, OUT_LANES), 2)
    packed = (jnp.where(lane == 0, total, 0.0)
              + jnp.where(lane == 1, recon, 0.0)
              + jnp.where(lane == 2, kl, 0.0))                      # (1, 1, 128)
    out_ref[...] = jnp.broadcast_to(packed, out_ref.shape).astype(out_ref.dtype)


def make_elbo_loss(kl_weight: float = 1.0, *, tile_rows=None,
                   small_path_max_bytes=_SMALL_PATH_MAX_BYTES):
    """Build a jitted ELBOLoss.forward equivalent with kl_weight frozen in.

    tile_rows: optional override of the batch tile size (forces the tiled path).
    """
    kernel = functools.partial(elbo_loss_kernel, kl_weight=float(kl_weight))
    vmem = pltpu.MemorySpace.VMEM

    @jax.jit
    def elbo_loss(recon_x, x, mean, log_var):
        b, g = recon_x.shape
        _, l = mean.shape

        total_in_bytes = sum(int(a.size) * a.dtype.itemsize
                             for a in (recon_x, x, mean, log_var))
        cost = pl.CostEstimate(
            flops=3 * b * g + 6 * b * l + 4,
            transcendentals=b * l,                         # exp(log_var)
            bytes_accessed=total_in_bytes + 4 * OUT_SUBLANES * OUT_LANES,
        )

        # ------------------------------------------------------------------
        # Gridless fast path: everything VMEM-resident, lane-dense views.
        # ------------------------------------------------------------------
        if tile_rows is None and total_in_bytes <= small_path_max_bytes:
            rx2, x2 = _lane_dense_2d(recon_x), _lane_dense_2d(x)
            m2, lv2 = _lane_dense_2d(mean), _lane_dense_2d(log_var)
            out = pl.pallas_call(
                kernel,
                out_shape=jax.ShapeDtypeStruct((1, OUT_SUBLANES, OUT_LANES), jnp.float32),
                in_specs=[pl.BlockSpec(memory_space=vmem) for _ in range(4)],
                out_specs=pl.BlockSpec(memory_space=vmem),
                cost_estimate=cost,
                compiler_params=pltpu.CompilerParams(vmem_limit_bytes=_TILED_VMEM_FLOOR),
            )(rx2, x2, m2, lv2)
            row = out[0, 0]
            return row[0], row[1], row[2]

        # ------------------------------------------------------------------
        # Batch-tiled path: "parallel" grid over batch tiles, per-tile partial rows.
        # ------------------------------------------------------------------
        sub = _sublane_multiple(recon_x.dtype)
        if tile_rows is not None:
            tb = _round_up(int(tile_rows), sub)
        else:
            # Per-step f32-equivalent budget across all columns of one row set.
            rows = _TILE_F32_BYTES_PER_ROWSET // (4 * (g + l))
            tb = max(sub, (rows // sub) * sub)
        tb = min(tb, _round_up(b, sub))
        b_pad = _round_up(b, tb)
        num_tiles = b_pad // tb

        def pad_b(a):
            # Zero batch-padding contributes exactly 0 to both loss terms (see above).
            return jnp.pad(a, ((0, b_pad - b), (0, 0))) if b_pad != b else a

        rx_p, x_p, m_p, lv_p = pad_b(recon_x), pad_b(x), pad_b(mean), pad_b(log_var)

        # Explicit VMEM budget (v7x-safe): double-buffered input tiles + f32 intermediates.
        big_tile = tb * g * recon_x.dtype.itemsize
        small_tile = tb * l * mean.dtype.itemsize
        f32_tiles = tb * (g + l) * 4
        vmem_limit = int(min(_TILED_VMEM_CAP,
                             max(_TILED_VMEM_FLOOR,
                                 4 * (big_tile + small_tile) + 3 * f32_tiles + (4 << 20))))

        out = pl.pallas_call(
            kernel,
            out_shape=jax.ShapeDtypeStruct((num_tiles, OUT_SUBLANES, OUT_LANES),
                                           jnp.float32),
            grid_spec=pltpu.PrefetchScalarGridSpec(
                num_scalar_prefetch=0,
                grid=(num_tiles,),
                in_specs=[pl.BlockSpec((tb, g), lambda i: (i, 0)),
                          pl.BlockSpec((tb, g), lambda i: (i, 0)),
                          pl.BlockSpec((tb, l), lambda i: (i, 0)),
                          pl.BlockSpec((tb, l), lambda i: (i, 0))],
                out_specs=pl.BlockSpec((1, OUT_SUBLANES, OUT_LANES),
                                       lambda i: (i, 0, 0)),
            ),
            cost_estimate=cost,
            compiler_params=pltpu.CompilerParams(
                dimension_semantics=("parallel",),
                vmem_limit_bytes=vmem_limit,
            ),
        )(rx_p, x_p, m_p, lv_p)

        # Combine per-tile partial rows (exact: total/recon/kl are linear in elements).
        row = jnp.sum(out[:, 0, :], axis=0)
        return row[0], row[1], row[2]

    return elbo_loss


if __name__ == "__main__":
    kl_weight = 1.0  # ELBOLoss default

    def ref_fn(rx, x, m, lv):
        recon = jnp.sum((rx - x) ** 2)
        klv = -0.5 * jnp.sum(1.0 + lv - m ** 2 - jnp.exp(lv))
        return recon + kl_weight * klv, recon, klv

    def check(got, ref, tol):
        for g_, r_ in zip(got, ref):
            rel = abs(float(g_) - float(r_)) / (abs(float(r_)) + 1e-6)
            assert rel < tol, f"mismatch: kernel={float(g_)} ref={float(r_)}"

    key = jax.random.PRNGKey(0)

    # ---- Case 1: small shapes consistent with the module -> gridless fast path ----
    B, G, L = 8, 128, 32
    k1, k2, k3, k4, key = jax.random.split(key, 5)
    recon_x = jax.random.normal(k1, (B, G), jnp.float32)
    x = jax.random.normal(k2, (B, G), jnp.float32)
    mean = jax.random.normal(k3, (B, L), jnp.float32)
    log_var = 0.1 * jax.random.normal(k4, (B, L), jnp.float32)

    loss_small = make_elbo_loss(kl_weight)
    got = jax.block_until_ready(loss_small(recon_x, x, mean, log_var))
    check(got, ref_fn(recon_x, x, mean, log_var), 1e-4)

    # ---- Case 2: exercise the batch-tiled "parallel" grid path (with batch padding) ----
    B2, G2, L2 = 200, 256, 48
    k1, k2, k3, k4, key = jax.random.split(key, 5)
    recon_x2 = jax.random.normal(k1, (B2, G2), jnp.float32)
    x2 = jax.random.normal(k2, (B2, G2), jnp.float32)
    mean2 = jax.random.normal(k3, (B2, L2), jnp.float32)
    log_var2 = 0.1 * jax.random.normal(k4, (B2, L2), jnp.float32)

    loss_tiled = make_elbo_loss(kl_weight, tile_rows=64)   # 4 tiles, 56 padded rows
    got2 = jax.block_until_ready(loss_tiled(recon_x2, x2, mean2, log_var2))
    check(got2, ref_fn(recon_x2, x2, mean2, log_var2), 1e-3)

    print("KERNEL_OK")
</pallas_src>

<mosaic_0001>
module attributes {stable_mosaic.version = 11 : i64} {
  func.func @elbo_loss_kernel(%arg0: memref<8x128xf32, #tpu.memory_space<vmem>>, %arg1: memref<8x128xf32, #tpu.memory_space<vmem>>, %arg2: memref<8x128xf32, #tpu.memory_space<vmem>>, %arg3: memref<8x128xf32, #tpu.memory_space<vmem>>, %arg4: memref<1x8x128xf32, #tpu.memory_space<vmem>>) attributes {dimension_semantics = [], scalar_prefetch = 0 : i64, scratch_operands = 0 : i64, tpu.core_type = #tpu.core_type<tc>} {
    %c0 = arith.constant 0 : index
    %c0_0 = arith.constant 0 : index
    %0 = vector.load %arg0[%c0, %c0_0] : memref<8x128xf32, #tpu.memory_space<vmem>>, vector<8x128xf32>
    %c0_1 = arith.constant 0 : index
    %c0_2 = arith.constant 0 : index
    %1 = vector.load %arg1[%c0_1, %c0_2] : memref<8x128xf32, #tpu.memory_space<vmem>>, vector<8x128xf32>
    %2 = arith.subf %0, %1 : vector<8x128xf32>
    %3 = arith.mulf %2, %2 : vector<8x128xf32>
    %cst = arith.constant dense<0.000000e+00> : vector<8xf32>
    %4 = vector.multi_reduction <add>, %3, %cst [1] : vector<8x128xf32> to vector<8xf32>
    %5 = vector.shape_cast %4 : vector<8xf32> to vector<8x1xf32>
    %cst_3 = arith.constant dense<0.000000e+00> : vector<1xf32>
    %6 = vector.multi_reduction <add>, %5, %cst_3 [0] : vector<8x1xf32> to vector<1xf32>
    %7 = vector.shape_cast %6 : vector<1xf32> to vector<1x1xf32>
    %c0_4 = arith.constant 0 : index
    %c0_5 = arith.constant 0 : index
    %8 = vector.load %arg2[%c0_4, %c0_5] : memref<8x128xf32, #tpu.memory_space<vmem>>, vector<8x128xf32>
    %c0_6 = arith.constant 0 : index
    %c0_7 = arith.constant 0 : index
    %9 = vector.load %arg3[%c0_6, %c0_7] : memref<8x128xf32, #tpu.memory_space<vmem>>, vector<8x128xf32>
    %cst_8 = arith.constant 1.000000e+00 : f32
    %10 = vector.broadcast %cst_8 : f32 to vector<8x128xf32>
    %11 = arith.addf %10, %9 : vector<8x128xf32>
    %12 = arith.mulf %8, %8 : vector<8x128xf32>
    %13 = arith.subf %11, %12 : vector<8x128xf32>
    %14 = math.exp %9 : vector<8x128xf32>
    %15 = arith.subf %13, %14 : vector<8x128xf32>
    %cst_9 = arith.constant dense<0.000000e+00> : vector<8xf32>
    %16 = vector.multi_reduction <add>, %15, %cst_9 [1] : vector<8x128xf32> to vector<8xf32>
    %17 = vector.shape_cast %16 : vector<8xf32> to vector<8x1xf32>
    %cst_10 = arith.constant dense<0.000000e+00> : vector<1xf32>
    %18 = vector.multi_reduction <add>, %17, %cst_10 [0] : vector<8x1xf32> to vector<1xf32>
    %19 = vector.shape_cast %18 : vector<1xf32> to vector<1x1xf32>
    %cst_11 = arith.constant -5.000000e-01 : f32
    %20 = vector.broadcast %cst_11 : f32 to vector<1x1xf32>
    %21 = arith.mulf %20, %19 : vector<1x1xf32>
    %cst_12 = arith.constant 1.000000e+00 : f32
    %22 = vector.broadcast %cst_12 : f32 to vector<1x1xf32>
    %23 = arith.mulf %22, %21 : vector<1x1xf32>
    %24 = arith.addf %7, %23 : vector<1x1xf32>
    %25 = tpu.iota {dimensions = array<i32: 2>} : vector<1x1x128xi32>
    %c0_i32 = arith.constant 0 : i32
    %26 = vector.broadcast %c0_i32 : i32 to vector<1x1x128xi32>
    %27 = arith.cmpi eq, %25, %26 : vector<1x1x128xi32>
    %cst_13 = arith.constant 0.000000e+00 : f32
    %28 = vector.shape_cast %24 : vector<1x1xf32> to vector<1x1x1xf32>
    %29 = vector.broadcast %28 : vector<1x1x1xf32> to vector<1x1x128xf32>
    %30 = vector.broadcast %cst_13 : f32 to vector<1x1x128xf32>
    %31 = arith.select %27, %29, %30 : vector<1x1x128xi1>, vector<1x1x128xf32>
    %c1_i32 = arith.constant 1 : i32
    %32 = vector.broadcast %c1_i32 : i32 to vector<1x1x128xi32>
    %33 = arith.cmpi eq, %25, %32 : vector<1x1x128xi32>
    %cst_14 = arith.constant 0.000000e+00 : f32
    %34 = vector.shape_cast %7 : vector<1x1xf32> to vector<1x1x1xf32>
    %35 = vector.broadcast %34 : vector<1x1x1xf32> to vector<1x1x128xf32>
    %36 = vector.broadcast %cst_14 : f32 to vector<1x1x128xf32>
    %37 = arith.select %33, %35, %36 : vector<1x1x128xi1>, vector<1x1x128xf32>
    %38 = arith.addf %31, %37 : vector<1x1x128xf32>
    %c2_i32 = arith.constant 2 : i32
    %39 = vector.broadcast %c2_i32 : i32 to vector<1x1x128xi32>
    %40 = arith.cmpi eq, %25, %39 : vector<1x1x128xi32>
    %cst_15 = arith.constant 0.000000e+00 : f32
    %41 = vector.shape_cast %21 : vector<1x1xf32> to vector<1x1x1xf32>
    %42 = vector.broadcast %41 : vector<1x1x1xf32> to vector<1x1x128xf32>
    %43 = vector.broadcast %cst_15 : f32 to vector<1x1x128xf32>
    %44 = arith.select %40, %42, %43 : vector<1x1x128xi1>, vector<1x1x128xf32>
    %45 = arith.addf %38, %44 : vector<1x1x128xf32>
    %46 = vector.shape_cast %45 : vector<1x1x128xf32> to vector<1x1x128xf32>
    %47 = vector.broadcast %46 : vector<1x1x128xf32> to vector<1x8x128xf32>
    %c0_16 = arith.constant 0 : index
    %c0_17 = arith.constant 0 : index
    %c0_18 = arith.constant 0 : index
    %48 = vector.load %arg4[%c0_16, %c0_17, %c0_18] : memref<1x8x128xf32, #tpu.memory_space<vmem>>, vector<1x8x128xf32>
    tpu.vector_store %arg4[%c0_16, %c0_17, %c0_18], %47 {strides = array<i32>} : memref<1x8x128xf32, #tpu.memory_space<vmem>>, vector<1x8x128xf32>,
    return
  }
}

</mosaic_0001>

<bundles_post_ra>
// kernel: elbo_loss.1
= control target key start
LH: loop header
LB: loop body
LE: loop exit
PB: predicated region body
PF: predicated region fallthrough
CT: control target
= control target key end

     0   :  { %v47_v22 = vlaneseq  ;;  %s104_s2 = inlined_call_operand.vmem [shape: f32[8,128], index: 2, kind: input, shape index: {}]   ;;  %s105_s3 = inlined_call_operand.vmem [shape: f32[8,128], index: 3, kind: input, shape index: {}]   ;;  %s106_s0 = inlined_call_operand.vmem [shape: f32[8,128], index: 0, kind: input, shape index: {}]   ;;  %s107_s1 = inlined_call_operand.vmem [shape: f32[8,128], index: 1, kind: input, shape index: {}]   ;;  %s108_s4 = inlined_call_operand.vmem [shape: f32[1,8,128], index: 4, kind: output, shape index: {}]  }
   0x1   :  { %v29_v0 = vld [vmem:[%s104_s2] sm:$0xff] }
   0x2   :  { %v30_v1 = vld [vmem:[%s105_s3] sm:$0xff]  ;;  %v32_v4 = vmul.f32 %v29_v0, %v29_v0  ;;  %v48_v26 = vand.u32 127, %v47_v22 }
   0x3   :  { %v34_v2 = vmul.f32 1.442695, %v30_v1  ;;  %v31_v3 = vadd.f32 1.0, %v30_v1  ;;  %v17_v7 = vld [vmem:[%s106_s0] sm:$0xff] }
   0x4   :  { %v18_v8 = vld [vmem:[%s107_s1] sm:$0xff]  ;;  %vm49_vm0 = vcmp.eq.s32.totalorder %v48_v26, 0  ;;  %vm51_vm1 = vcmp.eq.s32.totalorder %v48_v26, 1  ;;  %vm54_vm2 = vcmp.eq.s32.totalorder %v48_v26, 2 }
   0x5   :  { %62 = vpow2.f32 %v34_v2  ;;  %v33_v5 = vsub.f32 %v31_v3, %v32_v4  ;;  %v19_v10 = vsub.f32 %v17_v7, %v18_v8 }
   0x7   :  { %v20_v11 = vmul.f32 %v19_v10, %v19_v10 }
   0xb   :  { %v63_v6 = vpop.eup %62 }
   0xc   :  { %v36_v9 = vsub.f32 %v33_v5, %v63_v6 }
   0xe   :  { %37 = vadd.xlane.f32.xlu0 %v36_v9 }
  0x16   :  { %21 = vadd.xlane.f32.xlu0 %v20_v11 }
  0x81   :  { %v38_v12 = vpop.xlane.xlu0 %37 }
  0x82   :  { %v39_v13 = vrot.slane %v38_v12, 4 }
  0x84   :  { %v40_v14 = vadd.f32 %v39_v13, %v38_v12 }
  0x86   :  { %v41_v15 = vrot.slane %v40_v14, 2 }
  0x88   :  { %v42_v16 = vadd.f32 %v41_v15, %v40_v14 }
  0x89   :  { %v22_v17 = vpop.xlane.xlu0 %21 }
  0x8a   :  { %v23_v18 = vrot.slane %v22_v17, 4  ;;  %v43_v19 = vrot.slane %v42_v16, 1 }
  0x8c   :  { %v24_v20 = vadd.f32 %v23_v18, %v22_v17  ;;  %v44_v23 = vadd.f32 %v43_v19, %v42_v16 }
  0x8e   :  { %v25_v21 = vrot.slane %v24_v20, 2  ;;  %v45_v27 = vmul.f32 -0.5, %v44_v23 }
  0x90   :  { %v26_v24 = vadd.f32 %v25_v21, %v24_v20  ;;  %v55_v33 = vsel %vm54_vm2, %v45_v27, 0.0 }
  0x92   :  { %v27_v25 = vrot.slane %v26_v24, 1 }
  0x94   :  { %v28_v28 = vadd.f32 %v27_v25, %v26_v24 }
  0x96   :  { %v46_v29 = vadd.f32 %v45_v27, %v28_v28  ;;  %v52_v31 = vsel %vm51_vm1, %v28_v28, 0.0 }
  0x98   :  { %v50_v30 = vsel %vm49_vm0, %v46_v29, 0.0 }
  0x99   :  { %v53_v32 = vadd.f32 %v52_v31, %v50_v30 }
  0x9b   :  { %v56_v34 = vadd.f32 %v55_v33, %v53_v32 }
  0x9d   :  { %57 = vst [vmem:[%s108_s4] sm:$0xff] %v56_v34 }

</bundles_post_ra>
